<compile_context>
chip_gen: v6e
topology: v6e:2x2x1
jax: 0.10.0
libtpu: 0.0.40
codegen_flags: <defaults>
</compile_context>

<pallas_src>
import jax
import jax.numpy as jnp
from jax import lax
from jax.experimental import pallas as pl
from jax.experimental.pallas import tpu as pltpu


_TAN_PI_8 = 0.41421356237309503
_PI = 3.141592653589793
_PI_2 = 1.5707963267948966
_PI_4 = 0.7853981633974483


def _atan2(y, x):
    """float32 atan2 from VPU ops only (abs/min/max/div/where + Cephes atan poly).

    Matches jnp.arctan2 to ~1e-6 absolute error on finite inputs; atan2(0, 0) = 0.
    """
    abs_x = jnp.abs(x)
    abs_y = jnp.abs(y)
    big = jnp.maximum(abs_x, abs_y)
    small = jnp.minimum(abs_x, abs_y)
    safe_big = jnp.where(big > 0.0, big, 1.0)
    t = small / safe_big                                  # in [0, 1]
    reduce = t > _TAN_PI_8
    tr = jnp.where(reduce, (t - 1.0) / (t + 1.0), t)      # |tr| <= tan(pi/8)
    z = tr * tr
    p = 8.05374449538e-2
    p = p * z - 1.38776856032e-1
    p = p * z + 1.99777106478e-1
    p = p * z - 3.33329491539e-1
    a = p * z * tr + tr                                   # atan(tr)
    a = a + jnp.where(reduce, _PI_4, 0.0)                 # atan(small/big) in [0, pi/4]
    a = jnp.where(abs_y > abs_x, _PI_2 - a, a)            # first-octant unfold
    a = jnp.where(x < 0.0, _PI - a, a)
    a = jnp.where(y < 0.0, -a, a)
    return jnp.where(big == 0.0, 0.0, a)                  # atan2(0, 0) = 0


def _coordinate_expert_kernel(loc_ref, depot_ref, wn_ref, bn_ref, wd_ref, bd_ref,
                              out_ref):
    # loc_ref: (2, TN) — x row / y row, nodes on lanes.  depot_ref: (1, 2).
    tn = loc_ref.shape[1]
    x = loc_ref[0:1, :]                                   # (1, TN)
    y = loc_ref[1:2, :]
    dx = x - depot_ref[0:1, 0:1]
    dy = y - depot_ref[0:1, 1:2]
    ang = _atan2(dy, dx)                                  # (1, TN), full lane width

    # Feature slab (8, TN): rows [x; y; angle; 0*5], built with iota selects.
    r = lax.broadcasted_iota(jnp.int32, (8, tn), 0)
    slab = (jnp.where(r == 0, x, 0.0)
            + jnp.where(r == 1, y, 0.0)
            + jnp.where(r == 2, ang, 0.0))                # (8, TN)
    feats = jnp.transpose(slab, (1, 0))                   # (TN, 8), native-tiled xpose

    node = jnp.dot(feats, wn_ref[...],
                   preferred_element_type=jnp.float32)    # (TN, E) on MXU
    out_ref[...] = (node + bn_ref[...]).astype(out_ref.dtype)

    # Depot row (global row 0) uses the other Linear; only the first tile of a batch.
    @pl.when(pl.program_id(1) == 0)
    def _():
        d = depot_ref[...]                                # (1, 2)
        demb = (d[0:1, 0:1] * wd_ref[0:1, :]
                + d[0:1, 1:2] * wd_ref[1:2, :]
                + bd_ref[...])                            # (1, E), exact f32 on VPU
        out_ref[0:1, :] = demb.astype(out_ref.dtype)


def _pick_tile(n):
    # Largest tile in {512, 256, 128} dividing N, preferring >=2 tiles; else full N.
    for tn in (512, 256, 128):
        if n % tn == 0 and n // tn >= 2:
            return tn
    for tn in (512, 256, 128):
        if n % tn == 0:
            return tn
    return n


def coordinate_expert_forward(locs, params):
    """Equivalent of CoordinateExpert.forward. locs: (B, N, 2) -> (B, N, E)."""
    B, N, _ = locs.shape
    E = params["w_depot"].shape[0]

    # Layout plumbing (cheap: 2 floats per node), no full-size HBM transposes.
    locs_t = jnp.transpose(locs, (0, 2, 1)).astype(jnp.float32)     # (B, 2, N)
    depot = locs[:, :1, :].astype(jnp.float32)                      # (B, 1, 2)

    # torch Linear stores weight as (E, in); kernel consumes (in, E).
    wn = jnp.zeros((8, E), jnp.float32).at[:3, :].set(params["w_node"].T)
    bn = params["b_node"].reshape(1, E).astype(jnp.float32)
    wd = params["w_depot"].T.astype(jnp.float32)                    # (2, E)
    bd = params["b_depot"].reshape(1, E).astype(jnp.float32)

    TN = _pick_tile(N)
    grid = (B, N // TN)

    kernel = pl.pallas_call(
        _coordinate_expert_kernel,
        out_shape=jax.ShapeDtypeStruct((B, N, E), jnp.float32),
        grid_spec=pltpu.PrefetchScalarGridSpec(
            num_scalar_prefetch=0,
            grid=grid,
            in_specs=[
                pl.BlockSpec((None, 2, TN), lambda b, n: (b, 0, n)),   # locs_t tile
                pl.BlockSpec((None, 1, 2), lambda b, n: (b, 0, 0)),    # depot coords
                pl.BlockSpec((8, E), lambda b, n: (0, 0)),             # w_node (padded)
                pl.BlockSpec((1, E), lambda b, n: (0, 0)),             # b_node
                pl.BlockSpec((2, E), lambda b, n: (0, 0)),             # w_depot
                pl.BlockSpec((1, E), lambda b, n: (0, 0)),             # b_depot
            ],
            out_specs=pl.BlockSpec((None, TN, E), lambda b, n: (b, n, 0)),
        ),
        compiler_params=pltpu.CompilerParams(
            dimension_semantics=("parallel", "parallel")),
    )
    return kernel(locs_t, depot, wn, bn, wd, bd)


def reference_forward(locs, params):
    """Pure-JAX reference mirroring the PyTorch forward (HIGHEST-precision matmuls)."""
    depot = locs[:, :1, :]
    cities = locs[:, 1:, :]
    depot_emb = (jnp.matmul(depot, params["w_depot"].T,
                            precision=lax.Precision.HIGHEST) + params["b_depot"])
    centered = cities - depot
    angle = jnp.arctan2(centered[..., 1:], centered[..., :1])
    feats = jnp.concatenate([cities, angle], axis=-1)
    node_emb = (jnp.matmul(feats, params["w_node"].T,
                           precision=lax.Precision.HIGHEST) + params["b_node"])
    return jnp.concatenate([depot_emb, node_emb], axis=-2)


if __name__ == "__main__":
    B, N, E = 2, 512, 128   # batch, nodes (incl. depot), embed_dim
    key = jax.random.PRNGKey(0)
    k_l, k1, k2, k3, k4 = jax.random.split(key, 5)

    locs = jax.random.uniform(k_l, (B, N, 2), dtype=jnp.float32)
    params = {
        "w_depot": 0.1 * jax.random.normal(k1, (E, 2), dtype=jnp.float32),
        "b_depot": 0.1 * jax.random.normal(k2, (E,), dtype=jnp.float32),
        "w_node": 0.1 * jax.random.normal(k3, (E, 3), dtype=jnp.float32),
        "b_node": 0.1 * jax.random.normal(k4, (E,), dtype=jnp.float32),
    }

    out = coordinate_expert_forward(locs, params)
    jax.block_until_ready(out)

    ref = reference_forward(locs, params)
    assert out.shape == (B, N, E)
    max_err = float(jnp.max(jnp.abs(out - ref)))
    assert jnp.allclose(out, ref, atol=1e-4, rtol=1e-4), f"max abs err {max_err}"

    print("KERNEL_OK")
</pallas_src>

<mosaic_0001>
module attributes {stable_mosaic.version = 11 : i64} {
  func.func @_coordinate_expert_kernel(%arg0: i32, %arg1: i32, %arg2: memref<1x2x256xf32, #tpu.memory_space<vmem>>, %arg3: memref<1x1x2xf32, #tpu.memory_space<vmem>>, %arg4: memref<8x128xf32, #tpu.memory_space<vmem>>, %arg5: memref<1x128xf32, #tpu.memory_space<vmem>>, %arg6: memref<2x128xf32, #tpu.memory_space<vmem>>, %arg7: memref<1x128xf32, #tpu.memory_space<vmem>>, %arg8: memref<1x256x128xf32, #tpu.memory_space<vmem>>) attributes {dimension_semantics = [#tpu.dimension_semantics<parallel>, #tpu.dimension_semantics<parallel>], iteration_bounds = array<i64: 2, 2>, scalar_prefetch = 0 : i64, scratch_operands = 0 : i64, tpu.core_type = #tpu.core_type<tc>, window_params = [{transform_indices = @transform_0, window_bounds = array<i64: 1, 2, 256>}, {transform_indices = @transform_1, window_bounds = array<i64: 1, 1, 2>}, {pipeline_mode = #tpu.pipeline_mode<synchronous>, transform_indices = @transform_2, window_bounds = array<i64: 8, 128>}, {pipeline_mode = #tpu.pipeline_mode<synchronous>, transform_indices = @transform_3, window_bounds = array<i64: 1, 128>}, {pipeline_mode = #tpu.pipeline_mode<synchronous>, transform_indices = @transform_4, window_bounds = array<i64: 2, 128>}, {pipeline_mode = #tpu.pipeline_mode<synchronous>, transform_indices = @transform_5, window_bounds = array<i64: 1, 128>}, {transform_indices = @transform_6, window_bounds = array<i64: 1, 256, 128>}]} {
    %c0 = arith.constant 0 : index
    %c0_0 = arith.constant 0 : index
    %c0_1 = arith.constant 0 : index
    %0 = vector.load %arg2[%c0, %c0_0, %c0_1] : memref<1x2x256xf32, #tpu.memory_space<vmem>>, vector<1x1x256xf32>
    %1 = vector.shape_cast %0 : vector<1x1x256xf32> to vector<1x256xf32>
    %c0_2 = arith.constant 0 : index
    %c1 = arith.constant 1 : index
    %c0_3 = arith.constant 0 : index
    %2 = vector.load %arg2[%c0_2, %c1, %c0_3] : memref<1x2x256xf32, #tpu.memory_space<vmem>>, vector<1x1x256xf32>
    %3 = vector.shape_cast %2 : vector<1x1x256xf32> to vector<1x256xf32>
    %c0_4 = arith.constant 0 : index
    %c0_5 = arith.constant 0 : index
    %c0_6 = arith.constant 0 : index
    %4 = vector.load %arg3[%c0_4, %c0_5, %c0_6] : memref<1x1x2xf32, #tpu.memory_space<vmem>>, vector<1x1x1xf32>
    %5 = vector.shape_cast %4 : vector<1x1x1xf32> to vector<1x1xf32>
    %6 = vector.broadcast %5 : vector<1x1xf32> to vector<1x256xf32>
    %7 = arith.subf %1, %6 : vector<1x256xf32>
    %c0_7 = arith.constant 0 : index
    %c0_8 = arith.constant 0 : index
    %c1_9 = arith.constant 1 : index
    %8 = vector.load %arg3[%c0_7, %c0_8, %c1_9] : memref<1x1x2xf32, #tpu.memory_space<vmem>>, vector<1x1x1xf32>
    %9 = vector.shape_cast %8 : vector<1x1x1xf32> to vector<1x1xf32>
    %10 = vector.broadcast %9 : vector<1x1xf32> to vector<1x256xf32>
    %11 = arith.subf %3, %10 : vector<1x256xf32>
    %12 = math.absf %7 : vector<1x256xf32>
    %13 = math.absf %11 : vector<1x256xf32>
    %14 = arith.maximumf %12, %13 : vector<1x256xf32>
    %15 = arith.minimumf %12, %13 : vector<1x256xf32>
    %cst = arith.constant 0.000000e+00 : f32
    %16 = vector.broadcast %cst : f32 to vector<1x256xf32>
    %17 = arith.cmpf ogt, %14, %16 : vector<1x256xf32>
    %cst_10 = arith.constant 1.000000e+00 : f32
    %18 = vector.broadcast %cst_10 : f32 to vector<1x256xf32>
    %19 = arith.select %17, %14, %18 : vector<1x256xi1>, vector<1x256xf32>
    %20 = arith.divf %15, %19 : vector<1x256xf32>
    %cst_11 = arith.constant 0.414213568 : f32
    %21 = vector.broadcast %cst_11 : f32 to vector<1x256xf32>
    %22 = arith.cmpf ogt, %20, %21 : vector<1x256xf32>
    %cst_12 = arith.constant 1.000000e+00 : f32
    %23 = vector.broadcast %cst_12 : f32 to vector<1x256xf32>
    %24 = arith.subf %20, %23 : vector<1x256xf32>
    %cst_13 = arith.constant 1.000000e+00 : f32
    %25 = vector.broadcast %cst_13 : f32 to vector<1x256xf32>
    %26 = arith.addf %20, %25 : vector<1x256xf32>
    %27 = arith.divf %24, %26 : vector<1x256xf32>
    %28 = arith.select %22, %27, %20 : vector<1x256xi1>, vector<1x256xf32>
    %29 = arith.mulf %28, %28 : vector<1x256xf32>
    %cst_14 = arith.constant 0.0805374458 : f32
    %30 = vector.broadcast %cst_14 : f32 to vector<1x256xf32>
    %31 = arith.mulf %30, %29 : vector<1x256xf32>
    %cst_15 = arith.constant 0.138776854 : f32
    %32 = vector.broadcast %cst_15 : f32 to vector<1x256xf32>
    %33 = arith.subf %31, %32 : vector<1x256xf32>
    %34 = arith.mulf %33, %29 : vector<1x256xf32>
    %cst_16 = arith.constant 0.199777111 : f32
    %35 = vector.broadcast %cst_16 : f32 to vector<1x256xf32>
    %36 = arith.addf %34, %35 : vector<1x256xf32>
    %37 = arith.mulf %36, %29 : vector<1x256xf32>
    %cst_17 = arith.constant 0.333329499 : f32
    %38 = vector.broadcast %cst_17 : f32 to vector<1x256xf32>
    %39 = arith.subf %37, %38 : vector<1x256xf32>
    %40 = arith.mulf %39, %29 : vector<1x256xf32>
    %41 = arith.mulf %40, %28 : vector<1x256xf32>
    %42 = arith.addf %41, %28 : vector<1x256xf32>
    %cst_18 = arith.constant 0.785398185 : f32
    %cst_19 = arith.constant 0.000000e+00 : f32
    %43 = vector.broadcast %cst_18 : f32 to vector<1x256xf32>
    %44 = vector.broadcast %cst_19 : f32 to vector<1x256xf32>
    %45 = arith.select %22, %43, %44 : vector<1x256xi1>, vector<1x256xf32>
    %46 = arith.addf %42, %45 : vector<1x256xf32>
    %47 = arith.cmpf ogt, %13, %12 : vector<1x256xf32>
    %cst_20 = arith.constant 1.57079637 : f32
    %48 = vector.broadcast %cst_20 : f32 to vector<1x256xf32>
    %49 = arith.subf %48, %46 : vector<1x256xf32>
    %50 = arith.select %47, %49, %46 : vector<1x256xi1>, vector<1x256xf32>
    %cst_21 = arith.constant 0.000000e+00 : f32
    %51 = vector.broadcast %cst_21 : f32 to vector<1x256xf32>
    %52 = arith.cmpf olt, %7, %51 : vector<1x256xf32>
    %cst_22 = arith.constant 3.14159274 : f32
    %53 = vector.broadcast %cst_22 : f32 to vector<1x256xf32>
    %54 = arith.subf %53, %50 : vector<1x256xf32>
    %55 = arith.select %52, %54, %50 : vector<1x256xi1>, vector<1x256xf32>
    %cst_23 = arith.constant 0.000000e+00 : f32
    %56 = vector.broadcast %cst_23 : f32 to vector<1x256xf32>
    %57 = arith.cmpf olt, %11, %56 : vector<1x256xf32>
    %cst_24 = arith.constant 0.000000e+00 : f32
    %58 = vector.broadcast %cst_24 : f32 to vector<1x256xf32>
    %59 = arith.subf %58, %55 : vector<1x256xf32>
    %60 = arith.select %57, %59, %55 : vector<1x256xi1>, vector<1x256xf32>
    %cst_25 = arith.constant 0.000000e+00 : f32
    %61 = vector.broadcast %cst_25 : f32 to vector<1x256xf32>
    %62 = arith.cmpf oeq, %14, %61 : vector<1x256xf32>
    %cst_26 = arith.constant 0.000000e+00 : f32
    %63 = vector.broadcast %cst_26 : f32 to vector<1x256xf32>
    %64 = arith.select %62, %63, %60 : vector<1x256xi1>, vector<1x256xf32>
    %65 = tpu.iota {dimensions = array<i32: 0>} : vector<8x256xi32>
    %c0_i32 = arith.constant 0 : i32
    %66 = vector.broadcast %c0_i32 : i32 to vector<8x256xi32>
    %67 = arith.cmpi eq, %65, %66 : vector<8x256xi32>
    %cst_27 = arith.constant 0.000000e+00 : f32
    %68 = vector.shape_cast %1 : vector<1x256xf32> to vector<1x256xf32>
    %69 = vector.broadcast %68 : vector<1x256xf32> to vector<8x256xf32>
    %70 = vector.broadcast %cst_27 : f32 to vector<8x256xf32>
    %71 = arith.select %67, %69, %70 : vector<8x256xi1>, vector<8x256xf32>
    %c1_i32 = arith.constant 1 : i32
    %72 = vector.broadcast %c1_i32 : i32 to vector<8x256xi32>
    %73 = arith.cmpi eq, %65, %72 : vector<8x256xi32>
    %cst_28 = arith.constant 0.000000e+00 : f32
    %74 = vector.shape_cast %3 : vector<1x256xf32> to vector<1x256xf32>
    %75 = vector.broadcast %74 : vector<1x256xf32> to vector<8x256xf32>
    %76 = vector.broadcast %cst_28 : f32 to vector<8x256xf32>
    %77 = arith.select %73, %75, %76 : vector<8x256xi1>, vector<8x256xf32>
    %78 = arith.addf %71, %77 : vector<8x256xf32>
    %c2_i32 = arith.constant 2 : i32
    %79 = vector.broadcast %c2_i32 : i32 to vector<8x256xi32>
    %80 = arith.cmpi eq, %65, %79 : vector<8x256xi32>
    %cst_29 = arith.constant 0.000000e+00 : f32
    %81 = vector.shape_cast %64 : vector<1x256xf32> to vector<1x256xf32>
    %82 = vector.broadcast %81 : vector<1x256xf32> to vector<8x256xf32>
    %83 = vector.broadcast %cst_29 : f32 to vector<8x256xf32>
    %84 = arith.select %80, %82, %83 : vector<8x256xi1>, vector<8x256xf32>
    %85 = arith.addf %78, %84 : vector<8x256xf32>
    %86 = tpu.transpose %85, [1, 0] : vector<8x256xf32> -> vector<256x8xf32>
    %c0_30 = arith.constant 0 : index
    %c0_31 = arith.constant 0 : index
    %87 = vector.load %arg4[%c0_30, %c0_31] : memref<8x128xf32, #tpu.memory_space<vmem>>, vector<8x128xf32>
    %cst_32 = arith.constant dense<0.000000e+00> : vector<256x128xf32>
    %88 = tpu.matmul %86, %87, %cst_32 {dimension_numbers = #tpu.dot_dimension_numbers<[1], [0], [0], [1], [0, 0, 1, 1], [], []>} : vector<256x8xf32>, vector<8x128xf32>, vector<256x128xf32> -> vector<256x128xf32>
    %c0_33 = arith.constant 0 : index
    %c0_34 = arith.constant 0 : index
    %89 = vector.load %arg5[%c0_33, %c0_34] : memref<1x128xf32, #tpu.memory_space<vmem>>, vector<1x128xf32>
    %90 = vector.broadcast %89 : vector<1x128xf32> to vector<256x128xf32>
    %91 = arith.addf %88, %90 : vector<256x128xf32>
    %c0_35 = arith.constant 0 : index
    %c0_36 = arith.constant 0 : index
    %c0_37 = arith.constant 0 : index
    %92 = vector.load %arg8[%c0_35, %c0_36, %c0_37] : memref<1x256x128xf32, #tpu.memory_space<vmem>>, vector<1x256x128xf32>
    %93 = vector.shape_cast %92 : vector<1x256x128xf32> to vector<256x128xf32>
    %94 = vector.shape_cast %91 : vector<256x128xf32> to vector<1x256x128xf32>
    tpu.vector_store %arg8[%c0_35, %c0_36, %c0_37], %94 {strides = array<i32>} : memref<1x256x128xf32, #tpu.memory_space<vmem>>, vector<1x256x128xf32>,
    %c0_i32_38 = arith.constant 0 : i32
    %95 = arith.cmpi eq, %arg1, %c0_i32_38 : i32
    %96 = arith.extui %95 : i1 to i32
    %c0_i32_39 = arith.constant 0 : i32
    %97 = arith.cmpi ne, %96, %c0_i32_39 : i32
    scf.if %97 {
      %c0_40 = arith.constant 0 : index
      %c0_41 = arith.constant 0 : index
      %c0_42 = arith.constant 0 : index
      %98 = vector.load %arg3[%c0_40, %c0_41, %c0_42] : memref<1x1x2xf32, #tpu.memory_space<vmem>>, vector<1x1x2xf32>
      %99 = vector.shape_cast %98 : vector<1x1x2xf32> to vector<1x2xf32>
      %100 = vector.extract_strided_slice %99 {offsets = [0, 0], sizes = [1, 1], strides = [1, 1]} : vector<1x2xf32> to vector<1x1xf32>
      %c0_43 = arith.constant 0 : index
      %c0_44 = arith.constant 0 : index
      %101 = vector.load %arg6[%c0_43, %c0_44] : memref<2x128xf32, #tpu.memory_space<vmem>>, vector<1x128xf32>
      %102 = vector.broadcast %100 : vector<1x1xf32> to vector<1x128xf32>
      %103 = arith.mulf %102, %101 : vector<1x128xf32>
      %104 = vector.extract_strided_slice %99 {offsets = [0, 1], sizes = [1, 1], strides = [1, 1]} : vector<1x2xf32> to vector<1x1xf32>
      %c1_45 = arith.constant 1 : index
      %c0_46 = arith.constant 0 : index
      %105 = vector.load %arg6[%c1_45, %c0_46] : memref<2x128xf32, #tpu.memory_space<vmem>>, vector<1x128xf32>
      %106 = vector.broadcast %104 : vector<1x1xf32> to vector<1x128xf32>
      %107 = arith.mulf %106, %105 : vector<1x128xf32>
      %108 = arith.addf %103, %107 : vector<1x128xf32>
      %c0_47 = arith.constant 0 : index
      %c0_48 = arith.constant 0 : index
      %109 = vector.load %arg7[%c0_47, %c0_48] : memref<1x128xf32, #tpu.memory_space<vmem>>, vector<1x128xf32>
      %110 = arith.addf %108, %109 : vector<1x128xf32>
      %c0_49 = arith.constant 0 : index
      %c0_50 = arith.constant 0 : index
      %c0_51 = arith.constant 0 : index
      %111 = vector.load %arg8[%c0_49, %c0_50, %c0_51] : memref<1x256x128xf32, #tpu.memory_space<vmem>>, vector<1x1x128xf32>
      %112 = vector.shape_cast %111 : vector<1x1x128xf32> to vector<1x128xf32>
      %113 = vector.shape_cast %110 : vector<1x128xf32> to vector<1x1x128xf32>
      tpu.vector_store %arg8[%c0_49, %c0_50, %c0_51], %113 {strides = array<i32>} : memref<1x256x128xf32, #tpu.memory_space<vmem>>, vector<1x1x128xf32>,
    } else {
    }
    return
  }
  func.func @transform_0(%arg0: i32, %arg1: i32) -> (i32, i32, i32) {
    %c0_i32 = arith.constant 0 : i32
    %c0_i32_0 = arith.constant 0 : i32
    return %arg0, %c0_i32, %arg1 : i32, i32, i32
  }
  func.func @transform_1(%arg0: i32, %arg1: i32) -> (i32, i32, i32) {
    %c0_i32 = arith.constant 0 : i32
    %c0_i32_0 = arith.constant 0 : i32
    %c0_i32_1 = arith.constant 0 : i32
    return %arg0, %c0_i32, %c0_i32_0 : i32, i32, i32
  }
  func.func @transform_2(%arg0: i32, %arg1: i32) -> (i32, i32) {
    %c0_i32 = arith.constant 0 : i32
    %c0_i32_0 = arith.constant 0 : i32
    %c0_i32_1 = arith.constant 0 : i32
    return %c0_i32, %c0_i32_0 : i32, i32
  }
  func.func @transform_3(%arg0: i32, %arg1: i32) -> (i32, i32) {
    %c0_i32 = arith.constant 0 : i32
    %c0_i32_0 = arith.constant 0 : i32
    %c0_i32_1 = arith.constant 0 : i32
    return %c0_i32, %c0_i32_0 : i32, i32
  }
  func.func @transform_4(%arg0: i32, %arg1: i32) -> (i32, i32) {
    %c0_i32 = arith.constant 0 : i32
    %c0_i32_0 = arith.constant 0 : i32
    %c0_i32_1 = arith.constant 0 : i32
    return %c0_i32, %c0_i32_0 : i32, i32
  }
  func.func @transform_5(%arg0: i32, %arg1: i32) -> (i32, i32) {
    %c0_i32 = arith.constant 0 : i32
    %c0_i32_0 = arith.constant 0 : i32
    %c0_i32_1 = arith.constant 0 : i32
    return %c0_i32, %c0_i32_0 : i32, i32
  }
  func.func @transform_6(%arg0: i32, %arg1: i32) -> (i32, i32, i32) {
    %c0_i32 = arith.constant 0 : i32
    %c0_i32_0 = arith.constant 0 : i32
    return %arg0, %arg1, %c0_i32 : i32, i32, i32
  }
}

</mosaic_0001>

<bundles_post_ra>
// kernel: tpu_custom_call.1
= control target key start
LH: loop header
LB: loop body
LE: loop exit
PB: predicated region body
PF: predicated region fallthrough
CT: control target
= control target key end

     0   :  { %s1968_s0 = inlined_call_operand.hbm [shape: f32[2,2,512], index: 0, kind: input, shape index: {}]   ;;  %s1969_s1 = inlined_call_operand.hbm [shape: f32[2,1,2], index: 1, kind: input, shape index: {}]   ;;  %s1970_s2 = inlined_call_operand.hbm [shape: f32[8,128], index: 2, kind: input, shape index: {}]   ;;  %s1971_s3 = inlined_call_operand.vmem [shape: f32[1,128], index: 3, kind: input, shape index: {}]   ;;  %s1972_s4 = inlined_call_operand.vmem [shape: f32[2,128], index: 4, kind: input, shape index: {}]   ;;  %s1973_s5 = inlined_call_operand.vmem [shape: f32[1,128], index: 5, kind: input, shape index: {}]   ;;  %s1974_s6 = inlined_call_operand.hbm [shape: f32[2,512,128], index: 6, kind: output, shape index: {}]  }
   0x1   :  { %1986 = sst [smem:[#allocation21_spill]] %s1970_s2 }
   0x2   :  { %1987 = sst [smem:[#allocation22_spill]] %s1972_s4 }
   0x3   :  { %1988 = sst [smem:[#allocation23_spill]] %s1973_s5 }
   0x4   :  { %1989 = sst [smem:[#allocation24_spill]] %s1974_s6 }
   0x5   :  { %11 = vsyncpa [#allocation3], 0 }
   0x6   :  { %13 = vsyncpa [#allocation3 + $0x1], 0 }
   0x7   :  { %14 = vsyncpa [#allocation6], 0 }
   0x8   :  { %16 = vsyncpa [#allocation6 + $0x1], 0 }
   0x9   :  { %17 = vsyncpa [#allocation4], 0 }
   0xa   :  { %19 = vsyncpa [#allocation4 + $0x1], 0  ;;  %s1567_s21 = smov 0   ;;  %s1569_s22 = smov 0  }
   0xb   :  { %s1571_s23 = smov 0   ;;  %s1573_s24 = smov 0  }
   0xc   :  { %s1575_s25 = smov 0   ;;  %s1577_s26 = smov 0  }
   0xd   :  { %s1579_s27 = smov 0   ;;  %s1581_s28 = smov 0  }
   0xe   :  { %s1583_s29 = smov 0   ;;  %s1585_s30 = smov 0  }
   0xf   :  { %s1587_s7 = smov 0  }
  0x10 LB: > { %1990 = sst [smem:[#allocation13_spill]] %s1491_s24  ;;  %s1621_s8 = sadd.s32 4294967295, %s1519_s7   ;;  %s1519_s7 = sphi %s1587_s7, %s25_s7   ;;  %s1515_s30 = sphi %s1585_s30, %s2035_s30   ;;  %s1511_s29 = sphi %s1583_s29, %s2025_s29   ;;  %s1507_s28 = sphi %s1581_s28, %s2034_s28   ;;  %s1503_s27 = sphi %s1579_s27, %s2033_s27   ;;  %s1499_s26 = sphi %s1577_s26, %s2032_s26   ;;  %s1495_s25 = sphi %s1575_s25, %s2031_s25   ;;  %s1491_s24 = sphi %s1573_s24, %s2030_s24   ;;  %s1487_s23 = sphi %s1571_s23, %s2029_s23   ;;  %s1483_s22 = sphi %s1569_s22, %s2028_s22   ;;  %s1479_s21 = sphi %s1567_s21, %s2027_s21  }
  0x11   : > { %1991 = sst [smem:[#allocation14_spill]] %s1503_s27  ;;  %s1034_s9 = sadd.s32 4294967294, %s1519_s7  }
  0x12   : > { %1992 = sst [smem:[#allocation15_spill]] %s1507_s28  ;;  %p59_p0 = scmp.ne.s32.totalorder %s1495_s25, %s1491_s24 }
  0x13   : > { %1993 = sst [smem:[#allocation16_spill]] %s1511_s29  ;;  %p1984_p1 = scmp.eq.s32.totalorder %s1621_s8, 0 }
  0x14   : > { %p85_p2 = scmp.ne.s32.totalorder %s1483_s22, %s1479_s21  ;;  %p201_p5 = scmp.eq.s32.totalorder %s1034_s9, 3 }
  0x15   : > { %p1631_p4 = por %p1984_p1, %p59_p0  ;;  %p1035_p7 = scmp.ge.s32.totalorder %s1519_s7, 1 }
  0x16   : > { %p1637_p6 = por %p85_p2, %p1984_p1  ;;  %p1642_p8 = por %p201_p5, %p59_p0 }
  0x17   : > { %p208_p9 = scmp.lt.s32.totalorder %s1519_s7, 5  ;;  %s1521_s14 = smov [#allocation7]  }
  0x18   : > { %s1996_s12 = scalar_select %p1642_p8, 1, 0 }
  0x19   : > { %p1647_p10 = pnand %p1035_p7, %p208_p9  ;;  %s221_s15 = sshll.u32 %s1521_s14, 4  ;;  %s222_s15 = int_to_ptr.vmem [resolvable:$true] %s221_s15 }
  0x1a   : > { %1997 = sst [smem:[#allocation17_spill]] %s1996_s12  ;;  %s34_s16 = sadd.s32 1, %s1511_s29 }
  0x1b   : > { %p1186_p11 = pneg %p1647_p10  ;;  %s1320_s17 = scalar_lea.vmem %s222_s15, 128 }
  0x1c   : > { %p1321_p0 = scmp.ne.s32.totalorder %s222_s15, %s1320_s17  ;;  %p1328_p3 = scmp.lt.s32.totalorder %s222_s15, %s222_s15 }
  0x1d   : > { %p1187_p12 = pnand %p1186_p11, %p1984_p1  ;;  %p1329_p8 = scmp.lt.s32.totalorder %s1320_s17, %s1320_s17 }
  0x1f   : > { %p1311_p13 = pneg %p1187_p12  ;;  %p1330_p7 = por %p1329_p8, %p1328_p3 }
  0x21   : > { %p1323_p2 = pnand %p1321_p0, %p1311_p13 }
  0x23   : > { %p1324_p5 = pneg %p1323_p2 }
  0x25   : > { %p1331_p9 = pnand %p1330_p7, %p1324_p5 }
  0x27   : > { %1334 = shalt.err (!%p1331_p9)
}
  0x28   : > { %s1999_s2 = sld [smem:[#allocation21_spill]]  ;;  %p35_p3 = scmp.ge.s32.totalorder %s34_s16, 2 }
  0x29   : > { %s37_s20 = sadd.s32 1, %s1515_s30  ;;  %s46_s21 = sadd.s32 1, %s1499_s26 }
  0x2a   : > { %p53_p8 = scmp.ne.s32.totalorder %s1499_s26, %s1495_s25  ;;  %s2037_s16 = smov (%p35_p3, %s34_s16), 0 }
  0x2b   : > { %2000 = sst [smem:[#allocation18_spill]] %s2037_s16  ;;  %s2039_s20 = smov (!%p35_p3, %s37_s20), %s1515_s30 }
  0x2c   : > { %s42_s9 = ssub.s32 %s1511_s29, %s2037_s16  ;;  %p1985_p11 = scmp.eq.s32.totalorder %s1519_s7, 0 }
  0x2d   : > { %p39_p13 = scmp.ge.s32.totalorder %s2039_s20, 2  ;;  %p2001_p0 = scmp.eq.s32.totalorder %s1621_s8, 3 }
  0x2e   : > { %1189 = dma.hbm_to_vmem [thread:$0]  (!%p1187_p12), %s1999_s2, 128, %s222_s15, [#allocation6]  }
  0x2f   : > { %p1671_p2 = por %p2001_p0, %p53_p8  ;;  %p1677_p12 = por %p1985_p11, %p53_p8 }
  0x30   : > { %p1202_p5 = scmp.lt.s32.totalorder %s1519_s7, 4  ;;  %s2041_s20 = smov (%p39_p13, %s2039_s20), 0 }
  0x31   : > { %s2002_s14 = scalar_select %p1671_p2, 1, 0 }
  0x32   : > { %2005 = sst [smem:[#allocation20_spill]] %s2041_s20  ;;  %s241_s17 = sand.u32 1, %s1499_s26  }
  0x33   : > { %2003 = sst [smem:[#allocation19_spill]] %s2002_s14  ;;  %s1039_s18 = sshll.u32 %s1511_s29, 1 }
  0x34   : > { %s1688_s19 = ssub.s32 %s1515_s30, %s2041_s20  ;;  %s1038_s16 = sshll.u32 %s241_s17, 2 }
  0x35   : > { %s43_s2 = sor.u32 %s42_s9, %s1688_s19  ;;  %s1040_s12 = sshll.u32 %s1515_s30, 2 }
  0x36   : > { %p44_p9 = scmp.eq.s32.totalorder %s43_s2, 0  ;;  %s251_s6 = sadd.s32 %s1040_s12, %s1039_s18 }
  0x37   : > { %s245_s14 = scalar_lea.vmem [#allocation2], %s1038_s16  ;;  %s1041_s5 = sshll.u32 %s251_s6, 5 }
  0x38   : > { %s1694_s24 = scalar_select %p44_p9, %s1499_s26, %s46_s21  }
  0x39   : > { %s255_s28 = sshll.u32 %s245_s14, 4  ;;  %s253_s29 = scalar_lea.hbm %s1968_s0, %s1041_s5  ;;  %s256_s28 = int_to_ptr.vmem [resolvable:$true] %s255_s28 }
  0x3a   : > { %p1703_p3 = pnand %p1202_p5, %p1677_p12  ;;  %s262_s2 = sand.u32 1, %s1519_s7  }
  0x3b   : > { %s242_s9 = scalar_lea.sflag [#allocation3], %s241_s17  ;;  %s1348_s12 = scalar_lea.vmem %s256_s28, 64 }
  0x3c   : > { %p1337_p8 = pneg %p1703_p3  ;;  %p1349_p13 = scmp.ne.s32.totalorder %s256_s28, %s1348_s12 }
  0x3d   : > { %s1522_s6 = smov [#allocation2]  }
  0x3e   : > { %p1351_p0 = pnand %p1349_p13, %p1337_p8  ;;  %s1353_s16 = sshll.u32 %s1522_s6, 4  ;;  %s1354_s16 = int_to_ptr.vmem [resolvable:$false] %s1353_s16 }
  0x3f   : > { %s1355_s4 = scalar_lea.vmem %s1354_s16, 128  ;;  %p1356_p1 = scmp.lt.s32.totalorder %s256_s28, %s1354_s16 }
  0x40   : > { %p1352_p9 = pneg %p1351_p0  ;;  %p1357_p11 = scmp.lt.s32.totalorder %s1355_s4, %s1348_s12 }
  0x42   : > { %p1358_p7 = por %p1357_p11, %p1356_p1 }
  0x44   : > { %p1359_p12 = pnand %p1358_p7, %p1352_p9 }
  0x46   : > { %1362 = shalt.err (!%p1359_p12)
}
  0x47   : > { %1193 = dma.hbm_to_vmem [thread:$0]  (!%p1703_p3), %s253_s29, 64, %s256_s28, %s242_s9  }
  0x48   : > { %s72_s5 = sadd.s32 1, %s1487_s23  ;;  %p79_p8 = scmp.ne.s32.totalorder %s1487_s23, %s1483_s22 }
  0x49   : > { %p2007_p13 = scmp.eq.s32.totalorder %s1688_s19, 0  ;;  %p2008_p1 = scmp.eq.s32.totalorder %s1519_s7, 0 }
  0x4a   : > { %s264_s21 = sand.u32 1, %s1487_s23   ;;  %s1042_s14 = sshll.u32 %s1515_s30, 4 }
  0x4b   : > { %s1718_s27 = scalar_select %p2007_p13, %s1487_s23, %s72_s5  }
  0x4c   : > { %p81_p11 = por %p79_p8, %p2008_p1  ;;  %s270_s17 = scalar_lea.hbm %s1969_s1, %s1042_s14 }
  0x4d   : > { %s265_s18 = scalar_lea.vmem [#allocation5], %s264_s21  ;;  %s263_s28 = scalar_lea.sflag [#allocation6], %s262_s2 }
  0x4e   : > { %s272_s12 = sshll.u32 %s265_s18, 4  ;;  %p1729_p7 = pnand %p1202_p5, %p81_p11  ;;  %s273_s12 = int_to_ptr.vmem [resolvable:$true] %s272_s12 }
  0x4f   : > { %s1376_s29 = scalar_lea.vmem %s273_s12, 16  ;;  %s1523_s19 = smov [#allocation5]  }
  0x50   : > { %p1365_p3 = pneg %p1729_p7  ;;  %p1377_p0 = scmp.ne.s32.totalorder %s273_s12, %s1376_s29 }
  0x51   : > { %s1381_s9 = sshll.u32 %s1523_s19, 4  ;;  %s1382_s9 = int_to_ptr.vmem [resolvable:$false] %s1381_s9 }
  0x52   : > { %p1379_p9 = pnand %p1377_p0, %p1365_p3  ;;  %s1383_s16 = scalar_lea.vmem %s1382_s9, 32 }
  0x53   : > { %p1384_p8 = scmp.lt.s32.totalorder %s273_s12, %s1382_s9  ;;  %p1385_p13 = scmp.lt.s32.totalorder %s1383_s16, %s1376_s29 }
  0x54   : > { %p1380_p12 = pneg %p1379_p9 }
  0x55   : > { %p1386_p1 = por %p1385_p13, %p1384_p8 }
  0x57   : > { %p1387_p5 = pnand %p1386_p1, %p1380_p12 }
  0x59   : > { %1390 = shalt.err (!%p1387_p5)
}
  0x5a   : > { %1196 = dma.hbm_to_vmem [thread:$0]  (!%p1729_p7), %s270_s17, 16, %s273_s12, %s263_s28  }
  0x5b   : > { %281 = sbr.rel (%p1647_p10) target bundleno = 930 (0x3a2), region = 44  ;;  %s1740_s2 = sand.u32 (!%p1647_p10), 1, %s1495_s25  }
  0x5c   : > { %s1044_s4 = sshll.u32 (!%p1647_p10), %s1740_s2, 2  ;;  %s284_s5 = scalar_lea.sflag (!%p1647_p10), [#allocation3], %s1740_s2 }
  0x5d   : > { %s287_s21 = scalar_lea.vmem (!%p1647_p10), [#allocation2], %s1044_s4 }
  0x60   : > { %1462 = dma.done.wait (%p1631_p4), %s284_s5, 64  }
  0x61   : > { %1464 = vsyncadd (%p1631_p4), %s284_s5, 4294967232  ;;  %s292_s14 = sand.u32 1, %s1621_s8   ;;  %s294_s13 = sand.u32 1, %s1483_s22  }
  0x62   : > { %s293_s20 = scalar_lea.sflag [#allocation6], %s292_s14  ;;  %s1750_s15 = scalar_lea.vmem [#allocation5], %s294_s13 }
  0x63   : > { %1466 = dma.done.wait (%p1637_p6), %s293_s20, 16  }
  0x64   : > { %1468 = vsyncadd (%p1637_p6), %s293_s20, 4294967280  ;;  %p2010_p10 = scmp.eq.s32.totalorder %s1621_s8, 0 }
  0x66   : > { %1470 = dma.done.wait (%p2010_p10), [#allocation6], 128   ;;  %p2011_p11 = pmov %p2010_p10 }
  0x67   : > { %v1524_v0 = vmov 0   ;;  %v337_v1 = vld [vmem:[%s1750_s15] sm:$0x1]  ;;  %v1525_v2 = vmov 1   ;;  %v343_v3 = vlaneseq  ;;  %v1526_v47 = vmov 0.0   ;;  %v506_v61 = vld [vmem:[#allocation7] sm:$0xff] }
  0x68   : > { %1472 = vsyncadd (%p2011_p11), [#allocation6], 4294967168  ;;  %1301 = vset.pattern.permute.xlu0 %v1524_v0  ;;  %v334_v7 = vld [vmem:[%s287_s21] ss:$2 sm:$0x3]  ;;  %1124 = vmatprep.subr.mxu0 %v506_v61  ;;  %vm514_vm9 = vcmask 64512  }
  0x69   : > { %340 = vperm.xlu0 %1301, %v337_v1   ;;  %v1761_v4 = vshrl.u32 %v343_v3, 7  ;;  %v1047_v8 = vld [vmem:[%s287_s21 + $0x1] ss:$2 sm:$0x3]  ;;  %1174 = vmatprep.subr.mxu1 %v506_v61  ;;  %s1046_s8 = sshll.u32 %s1740_s2, 8  ;;  %s2012_s18 = sld [smem:[#allocation14_spill]] }
  0x6a   : > { %1125 = vmatpush3.msra.mxu0 %v506_v61  ;;  %1175 = vmatpush3.msra.mxu1 %v506_v61  ;;  %s1819_s17 = scalar_lea.vmem [#allocation8], %s1046_s8 }
  0x6b   : > { %v1764_v5 = vsub.s32 0, %v1761_v4  ;;  %v1767_v6 = vsub.s32 1, %v1761_v4  ;;  %vm396_vm0 = vcmp.eq.s32.totalorder %v1761_v4, 0  ;;  %vm410_vm1 = vcmp.eq.s32.totalorder %v1761_v4, 1 }
  0x6c   : > { %vm426_vm8 = vcmp.eq.s32.totalorder %v1761_v4, 2 }
  0x6d   : > { %1302 = vset.pattern.permute.xlu0 %v1525_v2  ;;  %v401_v9 = vrot.slane %v334_v7, %v1764_v5  ;;  %v415_v10 = vrot.slane %v1047_v8, %v1764_v5  ;;  %v405_v11 = vrot.slane %v334_v7, %v1767_v6  ;;  %v419_v12 = vrot.slane %v1047_v8, %v1767_v6 }
  0x6e   : > { %349 = vperm.xlu0 %1302, %v337_v1  }
  0x6f   : > { %v408_v13 = vsel %vm396_vm0, %v401_v9, 0.0  ;;  %v422_v14 = vsel %vm410_vm1, %v415_v10, 0.0  ;;  %v409_v15 = vsel %vm396_vm0, %v405_v11, 0.0  ;;  %v423_v16 = vsel %vm410_vm1, %v419_v12, 0.0  ;;  %p1084_p4 = scmp.ne.s32.totalorder %s2012_s18, 0 }
  0x70   : > { %v424_v17 = vadd.f32 %v422_v14, %v408_v13  ;;  %v425_v18 = vadd.f32 %v423_v16, %v409_v15  ;;  %s2013_s28 = sld [smem:[#allocation22_spill]] (!%p1084_p4) }
  0x71   : > { %s2015_s5 = sld [smem:[#allocation23_spill]] (!%p1084_p4) }
  0x76   : > { %s2014_s19 = smov (!%p1084_p4), %s2013_s28 }
  0xe4   : > { %v341_v19 = vpop.permute.xlu0 %340 }
  0xe5   : > { %v346_v20 = vrot.slane %v341_v19, %v1764_v5 }
  0xe7   : > { %v347_v22 = vsub.f32 %v334_v7, %v346_v20 }
  0xe9   : > { %v350_v21 = vpop.permute.xlu0 %349  ;;  %v357_v25 = vand.u32 2147483647, %v347_v22  ;;  %vm386_vm5 = vcmp.lt.f32.partialorder %v347_v22, 0.0 }
  0xea   : > { %v355_v23 = vrot.slane %v350_v21, %v1764_v5 }
  0xec   : > { %v356_v24 = vsub.f32 %v1047_v8, %v355_v23 }
  0xee   : > { %v358_v26 = vand.u32 2147483647, %v356_v24  ;;  %vm389_vm6 = vcmp.lt.f32.partialorder %v356_v24, 0.0 }
  0xf0   : > { %v359_v27 = vmax.f32 %v357_v25, %v358_v26  ;;  %v360_v29 = vmin.f32 %v357_v25, %v358_v26  ;;  %vm383_vm4 = vcmp.gt.f32.partialorder %v358_v26, %v357_v25 }
  0xf2   : > { %vm361_vm2 = vcmp.gt.f32.partialorder %v359_v27, 0.0  ;;  %vm392_vm7 = vcmp.eq.f32.partialorder %v359_v27, 0.0 }
  0xf3   : > { %v362_v28 = vsel %vm361_vm2, %v359_v27, 1.0 }
  0xf4   : > { %1303 = vrcp.f32 %v362_v28 }
 0x101   : > { %v1304_v30 = vpop.eup %1303 }
 0x102   : > { %v364_v31 = vmul.f32 %v1304_v30, %v360_v29 }
 0x104   : > { %v367_v32 = vadd.f32 1.0, %v364_v31  ;;  %v1048_v33 = vadd.f32 -1.0, %v364_v31  ;;  %vm365_vm3 = vcmp.gt.f32.partialorder %v364_v31, 0.41421357 }
 0x105   : > { %v381_v48 = vsel %vm365_vm3, 0.7853982, %v1526_v47 }
 0x106   : > { %1305 = vrcp.f32 %v367_v32 }
 0x113   : > { %v1306_v34 = vpop.eup %1305 }
 0x114   : > { %v369_v35 = vmul.f32 %v1306_v34, %v1048_v33  ;;  %v1816_v33 = vld [vmem:[%s1971_s3] ss:$0 sm:$0xff] }
 0x116   : > { %v370_v36 = vsel %vm365_vm3, %v369_v35, %v364_v31 }
 0x117   : > { %v371_v37 = vmul.f32 %v370_v36, %v370_v36 }
 0x119   : > { %v372_v38 = vmul.f32 0.080537446, %v371_v37 }
 0x11b   : > { %v1049_v39 = vadd.f32 -0.13877685, %v372_v38 }
 0x11d   : > { %v374_v40 = vmul.f32 %v1049_v39, %v371_v37 }
 0x11f   : > { %v375_v41 = vadd.f32 0.19977711, %v374_v40 }
 0x121   : > { %v376_v42 = vmul.f32 %v375_v41, %v371_v37 }
 0x123   : > { %v1050_v43 = vadd.f32 -0.3333295, %v376_v42 }
 0x125   : > { %v378_v44 = vmul.f32 %v1050_v43, %v371_v37 }
 0x127   : > { %v379_v45 = vmul.f32 %v378_v44, %v370_v36 }
 0x129   : > { %v380_v46 = vadd.f32 %v379_v45, %v370_v36 }
 0x12b   : > { %v382_v49 = vadd.f32 %v381_v48, %v380_v46 }
 0x12d   : > { %v384_v50 = vsub.f32 1.5707964, %v382_v49 }
 0x12f   : > { %v385_v51 = vsel %vm383_vm4, %v384_v50, %v382_v49 }
 0x130   : > { %v387_v52 = vsub.f32 3.1415927, %v385_v51 }
 0x132   : > { %v388_v53 = vsel %vm386_vm5, %v387_v52, %v385_v51 }
 0x133   : > { %v390_v54 = vsub.f32 0.0, %v388_v53 }
 0x135   : > { %v391_v55 = vsel %vm389_vm6, %v390_v54, %v388_v53 }
 0x136   : > { %v393_v56 = vsel %vm392_vm7, 0.0, %v391_v55 }
 0x137   : > { %v431_v57 = vrot.slane %v393_v56, %v1764_v5  ;;  %v435_v58 = vrot.slane %v393_v56, %v1767_v6 }
 0x139   : > { %v438_v59 = vsel %vm426_vm8, %v431_v57, 0.0  ;;  %v439_v60 = vsel %vm426_vm8, %v435_v58, 0.0 }
 0x13a   : > { %v440_v62 = vadd.f32 %v438_v59, %v424_v17  ;;  %v441_v63 = vadd.f32 %v439_v60, %v425_v18 }
 0x13c   : > { %442 = vxpose.xlu1.b32.start.end [1/1] (short) %v440_v62, 128 }
 0x179   : > { %474 = vxpose.xlu1.b32.start.end [1/1] (short) %v441_v63, 128 }
 0x1b8   : > { %v458_v0 = vpop.trf.xlu1 }
 0x1b9   : > { %1126 = vmatprep.mubr.msk.f32.mxu0 %vm514_vm9, %v458_v0 }
 0x1bc   : > { %v459_v1 = vpop.trf.xlu1 }
 0x1bd   : > { %1127 = vmatmul.mubr.msk.f32.vlgmr.msra.gmra.mxu0 %vm514_vm9, %v459_v1 }
 0x1c0   : > { %v460_v2 = vpop.trf.xlu1 }
 0x1c1   : > { %1129 = vmatprep.mubr.msk.f32.mxu0 %vm514_vm9, %v460_v2 }
 0x1c4   : > { %v461_v3 = vpop.trf.xlu1 }
 0x1c5   : > { %1130 = vmatmul.mubr.msk.f32.gmra.mxu0 %vm514_vm9, %v461_v3 }
 0x1c8   : > { %v462_v4 = vpop.trf.xlu1 }
 0x1c9   : > { %1132 = vmatprep.mubr.msk.f32.mxu0 %vm514_vm9, %v462_v4 }
 0x1cc   : > { %v463_v6 = vpop.trf.xlu1 }
 0x1cd   : > { %1133 = vmatmul.mubr.msk.f32.gmra.mxu0 %vm514_vm9, %v463_v6 }
 0x1d0   : > { %v464_v7 = vpop.trf.xlu1 }
 0x1d1   : > { %1135 = vmatprep.mubr.msk.f32.mxu0 %vm514_vm9, %v464_v7 }
 0x1d4   : > { %v465_v8 = vpop.trf.xlu1 }
 0x1d5   : > { %1136 = vmatmul.mubr.msk.f32.gmra.mxu0 %vm514_vm9, %v465_v8 }
 0x1d8   : > { %v466_v9 = vpop.trf.xlu1 }
 0x1d9   : > { %1138 = vmatprep.mubr.msk.f32.mxu0 %vm514_vm9, %v466_v9 }
 0x1dc   : > { %v467_v10 = vpop.trf.xlu1 }
 0x1dd   : > { %1139 = vmatmul.mubr.msk.f32.gmra.mxu0 %vm514_vm9, %v467_v10 }
 0x1e0   : > { %v468_v11 = vpop.trf.xlu1 }
 0x1e1   : > { %1141 = vmatprep.mubr.msk.f32.mxu0 %vm514_vm9, %v468_v11 }
 0x1e4   : > { %v469_v12 = vpop.trf.xlu1 }
 0x1e5   : > { %1142 = vmatmul.mubr.msk.f32.gmra.mxu0 %vm514_vm9, %v469_v12 }
 0x1e8   : > { %v470_v13 = vpop.trf.xlu1 }
 0x1e9   : > { %1144 = vmatprep.mubr.msk.f32.mxu0 %vm514_vm9, %v470_v13 }
 0x1ec   : > { %v471_v14 = vpop.trf.xlu1 }
 0x1ed   : > { %1145 = vmatmul.mubr.msk.f32.gmra.mxu0 %vm514_vm9, %v471_v14 }
 0x1f0   : > { %v472_v15 = vpop.trf.xlu1 }
 0x1f1   : > { %1147 = vmatprep.mubr.msk.f32.mxu0 %vm514_vm9, %v472_v15 }
 0x1f4   : > { %v473_v16 = vpop.trf.xlu1 }
 0x1f5   : > { %1148 = vmatmul.mubr.msk.f32.gmra.mxu0 %vm514_vm9, %v473_v16 }
 0x1f8   : > { %v490_v17 = vpop.trf.xlu1 }
 0x1f9   : > { %1150 = vmatprep.mubr.msk.f32.mxu1 %vm514_vm9, %v490_v17 }
 0x1fc   : > { %v491_v18 = vpop.trf.xlu1 }
 0x1fd   : > { %1151 = vmatmul.mubr.msk.f32.vlgmr.msra.gmra.mxu1 %vm514_vm9, %v491_v18 }
 0x200   : > { %v492_v19 = vpop.trf.xlu1 }
 0x201   : > { %1153 = vmatprep.mubr.msk.f32.mxu1 %vm514_vm9, %v492_v19 }
 0x204   : > { %v493_v20 = vpop.trf.xlu1 }
 0x205   : > { %1154 = vmatmul.mubr.msk.f32.gmra.mxu1 %vm514_vm9, %v493_v20 }
 0x208   : > { %v494_v21 = vpop.trf.xlu1 }
 0x209   : > { %1156 = vmatprep.mubr.msk.f32.mxu1 %vm514_vm9, %v494_v21 }
 0x20c   : > { %v495_v22 = vpop.trf.xlu1 }
 0x20d   : > { %1157 = vmatmul.mubr.msk.f32.gmra.mxu1 %vm514_vm9, %v495_v22 }
 0x210   : > { %v496_v23 = vpop.trf.xlu1 }
 0x211   : > { %1159 = vmatprep.mubr.msk.f32.mxu1 %vm514_vm9, %v496_v23 }
 0x214   : > { %v497_v24 = vpop.trf.xlu1 }
 0x215   : > { %1160 = vmatmul.mubr.msk.f32.gmra.mxu1 %vm514_vm9, %v497_v24 }
 0x218   : > { %v498_v25 = vpop.trf.xlu1 }
 0x219   : > { %1162 = vmatprep.mubr.msk.f32.mxu1 %vm514_vm9, %v498_v25 }
 0x21c   : > { %v499_v26 = vpop.trf.xlu1 }
 0x21d   : > { %1163 = vmatmul.mubr.msk.f32.gmra.mxu1 %vm514_vm9, %v499_v26 }
 0x220   : > { %v500_v27 = vpop.trf.xlu1 }
 0x221   : > { %1165 = vmatprep.mubr.msk.f32.mxu1 %vm514_vm9, %v500_v27 }
 0x224   : > { %v501_v28 = vpop.trf.xlu1 }
 0x225   : > { %1166 = vmatmul.mubr.msk.f32.gmra.mxu1 %vm514_vm9, %v501_v28 }
 0x228   : > { %v502_v29 = vpop.trf.xlu1 }
 0x229   : > { %1168 = vmatprep.mubr.msk.f32.mxu1 %vm514_vm9, %v502_v29 }
 0x22c   : > { %v503_v30 = vpop.trf.xlu1 }
 0x22d   : > { %1169 = vmatmul.mubr.msk.f32.gmra.mxu1 %vm514_vm9, %v503_v30 }
 0x230   : > { %v504_v31 = vpop.trf.xlu1 }
 0x231   : > { %1171 = vmatprep.mubr.msk.f32.mxu1 %vm514_vm9, %v504_v31 }
 0x234   : > { %v505_v32 = vpop.trf.xlu1 }
 0x235   : > { %1172 = vmatmul.mubr.msk.f32.gmra.mxu1 %vm514_vm9, %v505_v32 }
 0x27d   : > { %v1128_v34 = vpop.f32.mrf.mxu0 }
 0x27e   : > { %v683_v35 = vadd.f32 %v1128_v34, %v1816_v33 }
 0x27f   : > { %v677_v36 = vpop.f32.mrf.mxu0 }
 0x280   : > { %837 = vst [vmem:[%s1819_s17 + $0x8] sm:$0xff] %v683_v35  ;;  %v678_v37 = vadd.f32 %v1816_v33, %v677_v36 }
 0x282   : > { %836 = vst [vmem:[%s1819_s17] sm:$0xff] %v678_v37 }
 0x285   : > { %v1131_v38 = vpop.f32.mrf.mxu0 }
 0x286   : > { %v693_v39 = vadd.f32 %v1131_v38, %v1816_v33 }
 0x287   : > { %v687_v40 = vpop.f32.mrf.mxu0 }
 0x288   : > { %839 = vst [vmem:[%s1819_s17 + $0x18] sm:$0xff] %v693_v39  ;;  %v688_v41 = vadd.f32 %v1816_v33, %v687_v40 }
 0x28a   : > { %838 = vst [vmem:[%s1819_s17 + $0x10] sm:$0xff] %v688_v41 }
 0x28d   : > { %v1134_v42 = vpop.f32.mrf.mxu0 }
 0x28e   : > { %v703_v43 = vadd.f32 %v1134_v42, %v1816_v33 }
 0x28f   : > { %v697_v44 = vpop.f32.mrf.mxu0 }
 0x290   : > { %841 = vst [vmem:[%s1819_s17 + $0x28] sm:$0xff] %v703_v43  ;;  %v698_v45 = vadd.f32 %v1816_v33, %v697_v44 }
 0x292   : > { %840 = vst [vmem:[%s1819_s17 + $0x20] sm:$0xff] %v698_v45 }
 0x295   : > { %v1137_v46 = vpop.f32.mrf.mxu0 }
 0x296   : > { %v713_v47 = vadd.f32 %v1137_v46, %v1816_v33 }
 0x297   : > { %v707_v48 = vpop.f32.mrf.mxu0 }
 0x298   : > { %843 = vst [vmem:[%s1819_s17 + $0x38] sm:$0xff] %v713_v47  ;;  %v708_v49 = vadd.f32 %v1816_v33, %v707_v48 }
 0x29a   : > { %842 = vst [vmem:[%s1819_s17 + $0x30] sm:$0xff] %v708_v49 }
 0x29d   : > { %v1140_v50 = vpop.f32.mrf.mxu0 }
 0x29e   : > { %v723_v51 = vadd.f32 %v1140_v50, %v1816_v33 }
 0x29f   : > { %v717_v52 = vpop.f32.mrf.mxu0 }
 0x2a0   : > { %845 = vst [vmem:[%s1819_s17 + $0x48] sm:$0xff] %v723_v51  ;;  %v718_v53 = vadd.f32 %v1816_v33, %v717_v52 }
 0x2a2   : > { %844 = vst [vmem:[%s1819_s17 + $0x40] sm:$0xff] %v718_v53 }
 0x2a5   : > { %v1143_v54 = vpop.f32.mrf.mxu0 }
 0x2a6   : > { %v733_v55 = vadd.f32 %v1143_v54, %v1816_v33 }
 0x2a7   : > { %v727_v56 = vpop.f32.mrf.mxu0 }
 0x2a8   : > { %847 = vst [vmem:[%s1819_s17 + $0x58] sm:$0xff] %v733_v55  ;;  %v728_v57 = vadd.f32 %v1816_v33, %v727_v56 }
 0x2aa   : > { %846 = vst [vmem:[%s1819_s17 + $0x50] sm:$0xff] %v728_v57 }
 0x2ad   : > { %v1146_v58 = vpop.f32.mrf.mxu0 }
 0x2ae   : > { %v743_v59 = vadd.f32 %v1146_v58, %v1816_v33 }
 0x2af   : > { %v737_v60 = vpop.f32.mrf.mxu0 }
 0x2b0   : > { %849 = vst [vmem:[%s1819_s17 + $0x68] sm:$0xff] %v743_v59  ;;  %v738_v61 = vadd.f32 %v1816_v33, %v737_v60 }
 0x2b2   : > { %848 = vst [vmem:[%s1819_s17 + $0x60] sm:$0xff] %v738_v61 }
 0x2b5   : > { %v1149_v62 = vpop.f32.mrf.mxu0 }
 0x2b6   : > { %v753_v63 = vadd.f32 %v1149_v62, %v1816_v33 }
 0x2b7   : > { %v747_v0 = vpop.f32.mrf.mxu0 }
 0x2b8   : > { %851 = vst [vmem:[%s1819_s17 + $0x78] sm:$0xff] %v753_v63  ;;  %v748_v1 = vadd.f32 %v1816_v33, %v747_v0 }
 0x2ba   : > { %850 = vst [vmem:[%s1819_s17 + $0x70] sm:$0xff] %v748_v1 }
 0x2bd   : > { %v1152_v2 = vpop.f32.mrf.mxu1 }
 0x2be   : > { %v763_v3 = vadd.f32 %v1152_v2, %v1816_v33 }
 0x2bf   : > { %v757_v4 = vpop.f32.mrf.mxu1 }
 0x2c0   : > { %853 = vst [vmem:[%s1819_s17 + $0x88] sm:$0xff] %v763_v3  ;;  %v758_v6 = vadd.f32 %v1816_v33, %v757_v4 }
 0x2c2   : > { %852 = vst [vmem:[%s1819_s17 + $0x80] sm:$0xff] %v758_v6 }
 0x2c5   : > { %v1155_v7 = vpop.f32.mrf.mxu1 }
 0x2c6   : > { %v773_v8 = vadd.f32 %v1155_v7, %v1816_v33 }
 0x2c7   : > { %v767_v9 = vpop.f32.mrf.mxu1 }
 0x2c8   : > { %855 = vst [vmem:[%s1819_s17 + $0x98] sm:$0xff] %v773_v8  ;;  %v768_v10 = vadd.f32 %v1816_v33, %v767_v9 }
 0x2ca   : > { %854 = vst [vmem:[%s1819_s17 + $0x90] sm:$0xff] %v768_v10 }
 0x2cd   : > { %v1158_v11 = vpop.f32.mrf.mxu1 }
 0x2ce   : > { %v783_v12 = vadd.f32 %v1158_v11, %v1816_v33 }
 0x2cf   : > { %v777_v13 = vpop.f32.mrf.mxu1 }
 0x2d0   : > { %857 = vst [vmem:[%s1819_s17 + $0xa8] sm:$0xff] %v783_v12  ;;  %v778_v14 = vadd.f32 %v1816_v33, %v777_v13 }
 0x2d2   : > { %856 = vst [vmem:[%s1819_s17 + $0xa0] sm:$0xff] %v778_v14 }
 0x2d5   : > { %v1161_v15 = vpop.f32.mrf.mxu1 }
 0x2d6   : > { %v793_v16 = vadd.f32 %v1161_v15, %v1816_v33 }
 0x2d7   : > { %v787_v17 = vpop.f32.mrf.mxu1 }
 0x2d8   : > { %859 = vst [vmem:[%s1819_s17 + $0xb8] sm:$0xff] %v793_v16  ;;  %v788_v18 = vadd.f32 %v1816_v33, %v787_v17 }
 0x2da   : > { %858 = vst [vmem:[%s1819_s17 + $0xb0] sm:$0xff] %v788_v18 }
 0x2dd   : > { %v1164_v19 = vpop.f32.mrf.mxu1 }
 0x2de   : > { %v803_v20 = vadd.f32 %v1164_v19, %v1816_v33 }
 0x2df   : > { %v797_v21 = vpop.f32.mrf.mxu1 }
 0x2e0   : > { %861 = vst [vmem:[%s1819_s17 + $0xc8] sm:$0xff] %v803_v20  ;;  %v798_v22 = vadd.f32 %v1816_v33, %v797_v21 }
 0x2e2   : > { %860 = vst [vmem:[%s1819_s17 + $0xc0] sm:$0xff] %v798_v22 }
 0x2e5   : > { %v1167_v23 = vpop.f32.mrf.mxu1 }
 0x2e6   : > { %v813_v24 = vadd.f32 %v1167_v23, %v1816_v33 }
 0x2e7   : > { %v807_v25 = vpop.f32.mrf.mxu1 }
 0x2e8   : > { %863 = vst [vmem:[%s1819_s17 + $0xd8] sm:$0xff] %v813_v24  ;;  %v808_v26 = vadd.f32 %v1816_v33, %v807_v25 }
 0x2ea   : > { %862 = vst [vmem:[%s1819_s17 + $0xd0] sm:$0xff] %v808_v26 }
 0x2ed   : > { %v1170_v27 = vpop.f32.mrf.mxu1 }
 0x2ee   : > { %v823_v28 = vadd.f32 %v1170_v27, %v1816_v33 }
 0x2ef   : > { %v817_v29 = vpop.f32.mrf.mxu1 }
 0x2f0   : > { %865 = vst [vmem:[%s1819_s17 + $0xe8] sm:$0xff] %v823_v28  ;;  %v818_v30 = vadd.f32 %v1816_v33, %v817_v29 }
 0x2f2   : > { %864 = vst [vmem:[%s1819_s17 + $0xe0] sm:$0xff] %v818_v30 }
 0x2f5   : > { %v1173_v31 = vpop.f32.mrf.mxu1 }
 0x2f6   : > { %v833_v32 = vadd.f32 %v1173_v31, %v1816_v33  ;;  %871 = sbr.rel (%p1084_p4) target bundleno = 903 (0x387), region = 60 }
 0x2f7   : > { %v827_v34 = vpop.f32.mrf.mxu1 }
 0x2f8   : > { %867 = vst [vmem:[%s1819_s17 + $0xf8] sm:$0xff] %v833_v32  ;;  %v828_v35 = vadd.f32 %v1816_v33, %v827_v34 }
 0x2fa   : > { %866 = vst [vmem:[%s1819_s17 + $0xf0] sm:$0xff] %v828_v35 }
 0x2fb   : > { %v872_v36 = vld [vmem:[%s1750_s15] sm:$0x1]  ;;  %v1527_v37 = vmov 0   ;;  %v1528_v38 = vmov 1   ;;  %v884_v41 = vld [vmem:[%s2014_s19 + $0x1] sm:$0x1] }
 0x2fc   : > { %1307 = vset.pattern.permute.xlu0 %v1527_v37  ;;  %v873_v33 = vld [vmem:[%s2013_s28] sm:$0x1] }
 0x2fd   : > { %876 = vperm.xlu0 %1307, %v872_v36   ;;  %v895_v46 = vld [vmem:[%s2015_s5] sm:$0x1] }
 0x301   : > { %1308 = vset.pattern.permute.xlu0 %v1528_v38 }
 0x302   : > { %886 = vperm.xlu0 %1308, %v872_v36  }
 0x378   : > { %v877_v39 = vpop.permute.xlu0 %876 }
 0x379   : > { %v882_v40 = vrot.slane %v877_v39, %v1764_v5 }
 0x37b   : > { %v883_v44 = vmul.f32 %v882_v40, %v873_v33 }
 0x37d   : > { %v887_v42 = vpop.permute.xlu0 %886 }
 0x37e   : > { %v892_v43 = vrot.slane %v887_v42, %v1764_v5 }
 0x380   : > { %v893_v45 = vmul.f32 %v892_v43, %v884_v41 }
 0x382   : > { %v894_v47 = vadd.f32 %v893_v45, %v883_v44 }
 0x384   : > { %v896_v48 = vadd.f32 %v895_v46, %v894_v47 }
 0x386   : > { %897 = vst [vmem:[%s1819_s17] sm:$0x1] %v896_v48 }
 0x387 PF: > { %s2016_s21 = sld [smem:[#allocation14_spill]]  ;;  %s914_s8 = sshll.u32 %s1819_s17, 4  ;;  %s1901_s8 = int_to_ptr.vmem [resolvable:$true] %s914_s8 }
 0x388   : > { %s2017_s14 = sld [smem:[#allocation15_spill]]  ;;  %s899_s29 = scalar_lea.sflag [#allocation4], %s1740_s2 }
 0x389   : > { %s2019_s6 = sld [smem:[#allocation24_spill]]  ;;  %s1391_s9 = scalar_lea.vmem %s1901_s8, 4096 }
 0x38a   : > { %p1392_p6 = scmp.ne.s32.totalorder %s1901_s8, %s1391_s9  ;;  %s1529_s16 = smov [#allocation8]  }
 0x38b   : > { %s1395_s17 = sshll.u32 %s1529_s16, 4  ;;  %s1396_s17 = int_to_ptr.vmem [resolvable:$false] %s1395_s17 }
 0x38c   : > { %p1393_p7 = pnand %p1392_p6, %p1671_p2  ;;  %s1397_s4 = scalar_lea.vmem %s1396_s17, 8192 }
 0x38d   : > { %s1086_s20 = sshll.u32 %s2016_s21, 5  ;;  %p1398_p0 = scmp.lt.s32.totalorder %s1901_s8, %s1396_s17 }
 0x38e   : > { %s1087_s15 = sshll.u32 %s2017_s14, 6  ;;  %p1394_p3 = pneg %p1393_p7 }
 0x38f   : > { %s911_s10 = sadd.s32 %s1087_s15, %s1086_s20  ;;  %p1399_p9 = scmp.lt.s32.totalorder %s1397_s4, %s1391_s9 }
 0x390   : > { %s1088_s11 = sshll.u32 %s911_s10, 7 }
 0x391   : > { %s1906_s28 = scalar_lea.hbm %s2019_s6, %s1088_s11  ;;  %p1400_p12 = por %p1399_p9, %p1398_p0 }
 0x393   : > { %p1401_p8 = pnand %p1400_p12, %p1394_p3 }
 0x395   : > { %1404 = shalt.err (!%p1401_p8)
}
 0x396   : > { %s1405_s5 = scalar_lea.hbm %s1906_s28, 4096  ;;  %s1409_s20 = scalar_lea.hbm %s2019_s6, 16384 }
 0x397   : > { %p1406_p13 = scmp.ne.s32.totalorder %s1906_s28, %s1405_s5  ;;  %p1410_p10 = scmp.lt.s32.totalorder %s1906_s28, %s2019_s6 }
 0x398   : > { %p1411_p11 = scmp.lt.s32.totalorder %s1409_s20, %s1405_s5 }
 0x399   : > { %p1407_p1 = pnand %p1406_p13, %p1671_p2 }
 0x39a   : > { %p1412_p4 = por %p1411_p11, %p1410_p10 }
 0x39b   : > { %p1408_p5 = pneg %p1407_p1 }
 0x39d   : > { %p1413_p6 = pnand %p1412_p4, %p1408_p5 }
 0x39f   : > { %1416 = shalt.err (!%p1413_p6)
}
 0x3a0   : > { %s1530_s11 = smov 128   ;;  %s1531_s18 = smov 8  }
 0x3a1   : > { %1184 = dma.vmem_to_hbm [thread:$0]  (%p1671_p2), %s1901_s8, 4096, %s1906_s28, %s899_s29, %s1530_s11, %s1530_s11, %s1531_s18  }
 0x3a2 PF: > { %s2020_s12 = sld [smem:[#allocation13_spill]]  ;;  %p1204_p7 = scmp.ge.s32.totalorder %s1519_s7, 2 }
 0x3a3   : > { %s2021_s9 = sld [smem:[#allocation17_spill]] }
 0x3a8   : > { %s929_s16 = sand.u32 1, %s2020_s12  }
 0x3a9   : > { %p2022_p3 = scmp.ne.s32.totalorder %s2021_s9, 0  ;;  %s930_s17 = scalar_lea.sflag [#allocation4], %s929_s16 }
 0x3ab   : > { %p1198_p0 = pnand %p1204_p7, %p2022_p3 }
 0x3ad   : > { %p1199_p9 = pneg %p1198_p0 }
 0x3af   : > { %1474 = dma.done.wait (%p1199_p9), %s930_s17, 4096  }
 0x3b0   : > { %1476 = vsyncadd (%p1199_p9), %s930_s17, 4294963200  ;;  %s25_s7 = sadd.s32 1, %s1519_s7   ;;  %s2023_s2 = smov %s1694_s24 }
 0x3b1   : > { %p22_p12 = scmp.ge.s32.totalorder %s25_s7, 6   ;;  %s2024_s13 = sld [smem:[#allocation16_spill]] }
 0x3b2   : > { %s2025_s29 = sld [smem:[#allocation18_spill]]  ;;  %s2027_s21 = smov %s1483_s22 }
 0x3b3   : > { %s2026_s8 = sld [smem:[#allocation20_spill]]  ;;  %s2028_s22 = smov %s1487_s23 }
 0x3b4   : > { %s2029_s23 = smov %s1718_s27  ;;  %s2030_s24 = smov %s1495_s25 }
 0x3b5   : > { %s2031_s25 = smov %s1499_s26  ;;  %s2032_s26 = smov %s2023_s2 }
 0x3b6   : > { %s2034_s28 = smov %s1515_s30  ;;  %24 = sbr.rel (!%p22_p12) target bundleno = 16 (0x10), region = 111 }
 0x3b7   : > { %s2033_s27 = smov %s2024_s13 }
 0x3b9   : > { %s2035_s30 = smov %s2026_s8 }
 0x3bb   :  { %935 = vsyncpa [#allocation3], 1 }
 0x3bc   :  { %937 = vsyncpa [#allocation3 + $0x1], 1 }
 0x3bd   :  { %938 = vsyncpa [#allocation6], 1 }
 0x3be   :  { %940 = vsyncpa [#allocation6 + $0x1], 1 }
 0x3bf   :  { %941 = vsyncpa [#allocation4], 1 }
 0x3c0   :  { %943 = vsyncpa [#allocation4 + $0x1], 1 }

</bundles_post_ra>
